<compile_context>
chip_gen: v7x
topology: tpu7x:2x2x1
jax: 0.10.0
libtpu: 0.0.40
codegen_flags: <defaults>
</compile_context>

<pallas_src>
import functools

import jax
import jax.numpy as jnp
from jax.experimental import pallas as pl
from jax.experimental.pallas import tpu as pltpu


# ------------------------------ Pallas kernel ------------------------------ #

def _res_block_kernel(x_ref, w_ref, m_ref, out_ref, im_ref, *, W, eps):
    """Fused ResBlock for the B images of this grid step.

    x_ref  : (B, C, HW) f32   input tile (conv operand AND residual source)
    w_ref  : (2, C, 9C) f32   stacked conv taps: w_ref[j][o, k*C + i] = w_j[o, i, kh, kw]
    m_ref  : (8, HW)    f32   {0,1} validity row per non-center tap (k order, k=4 skipped)
    out_ref: (B, C, HW) f32
    im_ref : (9C, HW)   f32   VMEM scratch: im2col block (every row rewritten each conv)
    """
    B, C, HW = out_ref.shape
    mm = m_ref[...]                      # (8, HW), loaded once per invocation
    w1 = w_ref[0]                        # (C, 9C)
    w2 = w_ref[1]

    def build_im2col(a):
        # im_ref[k*C:(k+1)*C, :] = a shifted by (dy, dx) = (k//3 - 1, k%3 - 1), zero outside the
        # image.  pltpu.roll follows jnp.roll semantics, so a shift of (-s) % HW yields
        # result[i] = a[i + s]; circular wrap / row bleed is killed by the per-tap mask row.
        for k in range(9):
            dy, dx = k // 3 - 1, k % 3 - 1
            s = dy * W + dx
            if s == 0:
                v = a
            else:
                v = pltpu.roll(a, (-s) % HW, axis=1)          # XLU lane rotation
                j = k if k < 4 else k - 1
                v = v * mm[j:j + 1, :]                        # one multiply per tap
            im_ref[pl.ds(k * C, C), :] = v

    def instance_norm(a):
        # One-pass stats: two independent reductions (XLU); rsqrt lands on the EUP.
        inv_hw = 1.0 / HW
        mean = jnp.sum(a, axis=1, keepdims=True) * inv_hw
        ex2 = jnp.sum(a * a, axis=1, keepdims=True) * inv_hw
        var = ex2 - mean * mean
        return (a - mean) * jax.lax.rsqrt(var + eps)

    for b in range(B):
        x = x_ref[b]                                                   # (C, HW) f32

        # Conv2dBlock 1: conv3x3 -> InstanceNorm -> ReLU (bias cancelled by the IN mean-sub).
        build_im2col(x)
        a1 = jnp.dot(w1, im_ref[...], preferred_element_type=jnp.float32)
        y1 = jnp.maximum(instance_norm(a1), 0.0)                       # stays f32, stays on-chip

        # Conv2dBlock 2: conv3x3 -> InstanceNorm (no activation), then residual add (f32 x).
        build_im2col(y1)
        a2 = jnp.dot(w2, im_ref[...], preferred_element_type=jnp.float32)
        out_ref[b] = (instance_norm(a2) + x).astype(out_ref.dtype)


# --------------------------------- wrapper ---------------------------------- #

def _stack_taps(w_oihw):
    """(C_out, C_in, 3, 3) -> (C_out, 9*C_in) f32; column index = (kh*3 + kw)*C_in + c_in."""
    c_out, c_in = w_oihw.shape[0], w_oihw.shape[1]
    return jnp.transpose(w_oihw, (0, 2, 3, 1)).reshape(c_out, 9 * c_in).astype(jnp.float32)


def _edge_masks(H, W):
    """(8, H*W) f32 {0,1} validity rows, one per non-center 3x3 tap (k = 0..8, skipping 4)."""
    idx = jnp.arange(H * W, dtype=jnp.int32)
    col = idx % W
    row = idx // W
    rows = []
    for k in range(9):
        if k == 4:
            continue
        dy, dx = k // 3 - 1, k % 3 - 1
        ok = jnp.ones((H * W,), dtype=bool)
        if dy == -1:
            ok = ok & (row >= 1)
        elif dy == 1:
            ok = ok & (row <= H - 2)
        if dx == -1:
            ok = ok & (col >= 1)
        elif dx == 1:
            ok = ok & (col <= W - 2)
        rows.append(ok)
    return jnp.stack(rows).astype(jnp.float32)       # (8, H*W)


def res_block_forward(x_nchw, w1, b1, w2, b2, *, eps=1e-5, images_per_step=1):
    """ResBlock(dim, norm='in', activation='relu', pad_type='zero') forward.  x: NCHW.

    b1/b2 are accepted for interface parity but unused: a per-channel conv bias applied before
    InstanceNorm(affine=False, full-spatial mean) is removed exactly by the mean subtraction.
    Do NOT reuse this kernel for affine IN / BatchNorm / LayerNorm variants.

    images_per_step: images handled per grid step.  Default 1 keeps grid=(N,) "parallel" so
    v7x's two TensorCores split the batch; on single-TC v5e/v6e set it to N to collapse the
    serial grid and amortize the fixed per-step cost.
    """
    del b1, b2
    N, C, H, W = x_nchw.shape
    HW = H * W
    B = images_per_step if (images_per_step > 0 and N % images_per_step == 0) else 1

    x_flat = x_nchw.reshape(N, C, HW).astype(jnp.float32)
    w_stacked = jnp.stack([_stack_taps(w1), _stack_taps(w2)])          # (2, C, 9C) f32
    masks = _edge_masks(H, W)                                          # (8, HW) f32

    kernel = functools.partial(_res_block_kernel, W=W, eps=eps)

    out = pl.pallas_call(
        kernel,
        out_shape=jax.ShapeDtypeStruct((N, C, HW), jnp.float32),
        grid=(N // B,),
        in_specs=[
            pl.BlockSpec((B, C, HW), lambda n: (n, 0, 0)),             # input / residual (f32)
            pl.BlockSpec((2, C, 9 * C), lambda n: (0, 0, 0)),          # both convs' taps (1 fetch)
            pl.BlockSpec((8, HW), lambda n: (0, 0)),                   # edge masks (1 fetch)
        ],
        out_specs=pl.BlockSpec((B, C, HW), lambda n: (n, 0, 0)),
        scratch_shapes=[pltpu.VMEM((9 * C, HW), jnp.float32)],         # im2col block, reused
        compiler_params=pltpu.CompilerParams(
            dimension_semantics=("parallel",),     # batch grid shards across v7x's 2 TCs
            vmem_limit_bytes=32 * 1024 * 1024,
        ),
    )(x_flat, w_stacked, masks)

    # TODO(synk): for large H*W, tile the spatial axis (two-pass IN statistics) with tiles
    # budgeted against v7x's 64 MiB VMEM; for stacked ResBlocks, prefetch the next block's
    # (2, C, 9C) taps across pallas_calls instead of re-fetching them per call.
    return out.reshape(N, C, H, W)


# -------------------------------- reference --------------------------------- #

def _reference_res_block(x, w1, b1, w2, b2, eps=1e-5):
    def block(h, w, b, relu):
        y = jax.lax.conv_general_dilated(
            h, w, window_strides=(1, 1), padding=((1, 1), (1, 1)),
            dimension_numbers=("NCHW", "OIHW", "NCHW"),
        ) + b.reshape(1, -1, 1, 1)
        mean = y.mean(axis=(2, 3), keepdims=True)
        var = ((y - mean) ** 2).mean(axis=(2, 3), keepdims=True)
        y = (y - mean) / jnp.sqrt(var + eps)
        if relu:
            y = jnp.maximum(y, 0.0)
        return y

    y = block(x, w1, b1, True)
    y = block(y, w2, b2, False)
    return y + x


# ----------------------------------- main ------------------------------------ #

if __name__ == "__main__":
    key = jax.random.PRNGKey(0)
    k_x, k_w1, k_b1, k_w2, k_b2 = jax.random.split(key, 5)

    N, C, H, W = 2, 4, 16, 16          # dim = 4
    x = jax.random.normal(k_x, (N, C, H, W), dtype=jnp.float32)

    # Conv2d(dim, dim, 3, 1) parameters, deterministic synthetic init.
    w1 = jax.random.normal(k_w1, (C, C, 3, 3), dtype=jnp.float32) * 0.1
    b1 = jax.random.normal(k_b1, (C,), dtype=jnp.float32) * 0.1
    w2 = jax.random.normal(k_w2, (C, C, 3, 3), dtype=jnp.float32) * 0.1
    b2 = jax.random.normal(k_b2, (C,), dtype=jnp.float32) * 0.1

    out = jax.jit(res_block_forward)(x, w1, b1, w2, b2)
    out = jax.block_until_ready(out)

    ref = _reference_res_block(x, w1, b1, w2, b2)
    assert out.shape == (N, C, H, W)
    assert bool(jnp.all(jnp.isfinite(out)))
    assert jnp.allclose(out, ref, atol=5e-2, rtol=5e-2)

    print("KERNEL_OK")
</pallas_src>

<mosaic_0001>
module attributes {stable_mosaic.version = 11 : i64} {
  func.func @_res_block_kernel(%arg0: i32, %arg1: memref<1x4x256xf32, #tpu.memory_space<vmem>>, %arg2: memref<2x4x36xf32, #tpu.memory_space<vmem>>, %arg3: memref<8x256xf32, #tpu.memory_space<vmem>>, %arg4: memref<1x4x256xf32, #tpu.memory_space<vmem>>, %arg5: memref<36x256xf32, #tpu.memory_space<vmem>>) attributes {dimension_semantics = [#tpu.dimension_semantics<parallel>], iteration_bounds = array<i64: 2>, scalar_prefetch = 0 : i64, scratch_operands = 1 : i64, tpu.core_type = #tpu.core_type<tc>, window_params = [{transform_indices = @transform_0, window_bounds = array<i64: 1, 4, 256>}, {pipeline_mode = #tpu.pipeline_mode<synchronous>, transform_indices = @transform_1, window_bounds = array<i64: 2, 4, 36>}, {pipeline_mode = #tpu.pipeline_mode<synchronous>, transform_indices = @transform_2, window_bounds = array<i64: 8, 256>}, {transform_indices = @transform_3, window_bounds = array<i64: 1, 4, 256>}]} {
    %c0 = arith.constant 0 : index
    %c0_0 = arith.constant 0 : index
    %0 = vector.load %arg3[%c0, %c0_0] : memref<8x256xf32, #tpu.memory_space<vmem>>, vector<8x256xf32>
    %c0_1 = arith.constant 0 : index
    %c0_2 = arith.constant 0 : index
    %c0_3 = arith.constant 0 : index
    %1 = vector.load %arg2[%c0_1, %c0_2, %c0_3] : memref<2x4x36xf32, #tpu.memory_space<vmem>>, vector<1x4x36xf32>
    %2 = vector.shape_cast %1 : vector<1x4x36xf32> to vector<4x36xf32>
    %c1 = arith.constant 1 : index
    %c0_4 = arith.constant 0 : index
    %c0_5 = arith.constant 0 : index
    %3 = vector.load %arg2[%c1, %c0_4, %c0_5] : memref<2x4x36xf32, #tpu.memory_space<vmem>>, vector<1x4x36xf32>
    %4 = vector.shape_cast %3 : vector<1x4x36xf32> to vector<4x36xf32>
    %c0_6 = arith.constant 0 : index
    %c0_7 = arith.constant 0 : index
    %c0_8 = arith.constant 0 : index
    %5 = vector.load %arg1[%c0_6, %c0_7, %c0_8] : memref<1x4x256xf32, #tpu.memory_space<vmem>>, vector<1x4x256xf32>
    %6 = vector.shape_cast %5 : vector<1x4x256xf32> to vector<4x256xf32>
    %c17_i32 = arith.constant 17 : i32
    %7 = tpu.dynamic_rotate %6 by %c17_i32 dim 1 : vector<4x256xf32>, i32 -> vector<4x256xf32>
    %8 = vector.extract_strided_slice %0 {offsets = [0, 0], sizes = [1, 256], strides = [1, 1]} : vector<8x256xf32> to vector<1x256xf32>
    %9 = vector.broadcast %8 : vector<1x256xf32> to vector<4x256xf32>
    %10 = arith.mulf %7, %9 : vector<4x256xf32>
    %c0_9 = arith.constant 0 : index
    %c0_10 = arith.constant 0 : index
    %11 = vector.load %arg5[%c0_9, %c0_10] : memref<36x256xf32, #tpu.memory_space<vmem>>, vector<4x256xf32>
    tpu.vector_store %arg5[%c0_9, %c0_10], %10 {strides = array<i32>} : memref<36x256xf32, #tpu.memory_space<vmem>>, vector<4x256xf32>,
    %c16_i32 = arith.constant 16 : i32
    %12 = tpu.dynamic_rotate %6 by %c16_i32 dim 1 : vector<4x256xf32>, i32 -> vector<4x256xf32>
    %13 = vector.extract_strided_slice %0 {offsets = [1, 0], sizes = [1, 256], strides = [1, 1]} : vector<8x256xf32> to vector<1x256xf32>
    %14 = vector.broadcast %13 : vector<1x256xf32> to vector<4x256xf32>
    %15 = arith.mulf %12, %14 : vector<4x256xf32>
    %c4 = arith.constant 4 : index
    %c0_11 = arith.constant 0 : index
    %16 = vector.load %arg5[%c4, %c0_11] : memref<36x256xf32, #tpu.memory_space<vmem>>, vector<4x256xf32>
    tpu.vector_store %arg5[%c4, %c0_11], %15 {strides = array<i32>} : memref<36x256xf32, #tpu.memory_space<vmem>>, vector<4x256xf32>,
    %c15_i32 = arith.constant 15 : i32
    %17 = tpu.dynamic_rotate %6 by %c15_i32 dim 1 : vector<4x256xf32>, i32 -> vector<4x256xf32>
    %18 = vector.extract_strided_slice %0 {offsets = [2, 0], sizes = [1, 256], strides = [1, 1]} : vector<8x256xf32> to vector<1x256xf32>
    %19 = vector.broadcast %18 : vector<1x256xf32> to vector<4x256xf32>
    %20 = arith.mulf %17, %19 : vector<4x256xf32>
    %c8 = arith.constant 8 : index
    %c0_12 = arith.constant 0 : index
    %21 = vector.load %arg5[%c8, %c0_12] : memref<36x256xf32, #tpu.memory_space<vmem>>, vector<4x256xf32>
    tpu.vector_store %arg5[%c8, %c0_12], %20 {strides = array<i32>} : memref<36x256xf32, #tpu.memory_space<vmem>>, vector<4x256xf32>,
    %c1_i32 = arith.constant 1 : i32
    %22 = tpu.dynamic_rotate %6 by %c1_i32 dim 1 : vector<4x256xf32>, i32 -> vector<4x256xf32>
    %23 = vector.extract_strided_slice %0 {offsets = [3, 0], sizes = [1, 256], strides = [1, 1]} : vector<8x256xf32> to vector<1x256xf32>
    %24 = vector.broadcast %23 : vector<1x256xf32> to vector<4x256xf32>
    %25 = arith.mulf %22, %24 : vector<4x256xf32>
    %c12 = arith.constant 12 : index
    %c0_13 = arith.constant 0 : index
    %26 = vector.load %arg5[%c12, %c0_13] : memref<36x256xf32, #tpu.memory_space<vmem>>, vector<4x256xf32>
    tpu.vector_store %arg5[%c12, %c0_13], %25 {strides = array<i32>} : memref<36x256xf32, #tpu.memory_space<vmem>>, vector<4x256xf32>,
    %c16 = arith.constant 16 : index
    %c0_14 = arith.constant 0 : index
    %27 = vector.load %arg5[%c16, %c0_14] : memref<36x256xf32, #tpu.memory_space<vmem>>, vector<4x256xf32>
    tpu.vector_store %arg5[%c16, %c0_14], %6 {strides = array<i32>} : memref<36x256xf32, #tpu.memory_space<vmem>>, vector<4x256xf32>,
    %c255_i32 = arith.constant 255 : i32
    %28 = tpu.dynamic_rotate %6 by %c255_i32 dim 1 : vector<4x256xf32>, i32 -> vector<4x256xf32>
    %29 = vector.extract_strided_slice %0 {offsets = [4, 0], sizes = [1, 256], strides = [1, 1]} : vector<8x256xf32> to vector<1x256xf32>
    %30 = vector.broadcast %29 : vector<1x256xf32> to vector<4x256xf32>
    %31 = arith.mulf %28, %30 : vector<4x256xf32>
    %c20 = arith.constant 20 : index
    %c0_15 = arith.constant 0 : index
    %32 = vector.load %arg5[%c20, %c0_15] : memref<36x256xf32, #tpu.memory_space<vmem>>, vector<4x256xf32>
    tpu.vector_store %arg5[%c20, %c0_15], %31 {strides = array<i32>} : memref<36x256xf32, #tpu.memory_space<vmem>>, vector<4x256xf32>,
    %c241_i32 = arith.constant 241 : i32
    %33 = tpu.dynamic_rotate %6 by %c241_i32 dim 1 : vector<4x256xf32>, i32 -> vector<4x256xf32>
    %34 = vector.extract_strided_slice %0 {offsets = [5, 0], sizes = [1, 256], strides = [1, 1]} : vector<8x256xf32> to vector<1x256xf32>
    %35 = vector.broadcast %34 : vector<1x256xf32> to vector<4x256xf32>
    %36 = arith.mulf %33, %35 : vector<4x256xf32>
    %c24 = arith.constant 24 : index
    %c0_16 = arith.constant 0 : index
    %37 = vector.load %arg5[%c24, %c0_16] : memref<36x256xf32, #tpu.memory_space<vmem>>, vector<4x256xf32>
    tpu.vector_store %arg5[%c24, %c0_16], %36 {strides = array<i32>} : memref<36x256xf32, #tpu.memory_space<vmem>>, vector<4x256xf32>,
    %c240_i32 = arith.constant 240 : i32
    %38 = tpu.dynamic_rotate %6 by %c240_i32 dim 1 : vector<4x256xf32>, i32 -> vector<4x256xf32>
    %39 = vector.extract_strided_slice %0 {offsets = [6, 0], sizes = [1, 256], strides = [1, 1]} : vector<8x256xf32> to vector<1x256xf32>
    %40 = vector.broadcast %39 : vector<1x256xf32> to vector<4x256xf32>
    %41 = arith.mulf %38, %40 : vector<4x256xf32>
    %c28 = arith.constant 28 : index
    %c0_17 = arith.constant 0 : index
    %42 = vector.load %arg5[%c28, %c0_17] : memref<36x256xf32, #tpu.memory_space<vmem>>, vector<4x256xf32>
    tpu.vector_store %arg5[%c28, %c0_17], %41 {strides = array<i32>} : memref<36x256xf32, #tpu.memory_space<vmem>>, vector<4x256xf32>,
    %c239_i32 = arith.constant 239 : i32
    %43 = tpu.dynamic_rotate %6 by %c239_i32 dim 1 : vector<4x256xf32>, i32 -> vector<4x256xf32>
    %44 = vector.extract_strided_slice %0 {offsets = [7, 0], sizes = [1, 256], strides = [1, 1]} : vector<8x256xf32> to vector<1x256xf32>
    %45 = vector.broadcast %44 : vector<1x256xf32> to vector<4x256xf32>
    %46 = arith.mulf %43, %45 : vector<4x256xf32>
    %c32 = arith.constant 32 : index
    %c0_18 = arith.constant 0 : index
    %47 = vector.load %arg5[%c32, %c0_18] : memref<36x256xf32, #tpu.memory_space<vmem>>, vector<4x256xf32>
    tpu.vector_store %arg5[%c32, %c0_18], %46 {strides = array<i32>} : memref<36x256xf32, #tpu.memory_space<vmem>>, vector<4x256xf32>,
    %c0_19 = arith.constant 0 : index
    %c0_20 = arith.constant 0 : index
    %48 = vector.load %arg5[%c0_19, %c0_20] : memref<36x256xf32, #tpu.memory_space<vmem>>, vector<36x256xf32>
    %cst = arith.constant dense<0.000000e+00> : vector<4x256xf32>
    %49 = tpu.matmul %2, %48, %cst {dimension_numbers = #tpu.dot_dimension_numbers<[1], [0], [0], [1], [0, 0, 1, 1], [], []>} : vector<4x36xf32>, vector<36x256xf32>, vector<4x256xf32> -> vector<4x256xf32>
    %cst_21 = arith.constant dense<0.000000e+00> : vector<4xf32>
    %50 = vector.multi_reduction <add>, %49, %cst_21 [1] : vector<4x256xf32> to vector<4xf32>
    %51 = vector.shape_cast %50 : vector<4xf32> to vector<4x1xf32>
    %cst_22 = arith.constant 3.906250e-03 : f32
    %52 = vector.broadcast %cst_22 : f32 to vector<4x1xf32>
    %53 = arith.mulf %51, %52 : vector<4x1xf32>
    %54 = arith.mulf %49, %49 : vector<4x256xf32>
    %cst_23 = arith.constant dense<0.000000e+00> : vector<4xf32>
    %55 = vector.multi_reduction <add>, %54, %cst_23 [1] : vector<4x256xf32> to vector<4xf32>
    %56 = vector.shape_cast %55 : vector<4xf32> to vector<4x1xf32>
    %cst_24 = arith.constant 3.906250e-03 : f32
    %57 = vector.broadcast %cst_24 : f32 to vector<4x1xf32>
    %58 = arith.mulf %56, %57 : vector<4x1xf32>
    %59 = arith.mulf %53, %53 : vector<4x1xf32>
    %60 = arith.subf %58, %59 : vector<4x1xf32>
    %61 = vector.broadcast %53 : vector<4x1xf32> to vector<4x256xf32>
    %62 = arith.subf %49, %61 : vector<4x256xf32>
    %cst_25 = arith.constant 9.99999974E-6 : f32
    %63 = vector.broadcast %cst_25 : f32 to vector<4x1xf32>
    %64 = arith.addf %60, %63 : vector<4x1xf32>
    %65 = math.rsqrt %64 : vector<4x1xf32>
    %66 = vector.broadcast %65 : vector<4x1xf32> to vector<4x256xf32>
    %67 = arith.mulf %62, %66 : vector<4x256xf32>
    %cst_26 = arith.constant 0.000000e+00 : f32
    %68 = vector.broadcast %cst_26 : f32 to vector<4x256xf32>
    %69 = arith.maximumf %67, %68 : vector<4x256xf32>
    %c17_i32_27 = arith.constant 17 : i32
    %70 = tpu.dynamic_rotate %69 by %c17_i32_27 dim 1 : vector<4x256xf32>, i32 -> vector<4x256xf32>
    %71 = vector.extract_strided_slice %0 {offsets = [0, 0], sizes = [1, 256], strides = [1, 1]} : vector<8x256xf32> to vector<1x256xf32>
    %72 = vector.broadcast %71 : vector<1x256xf32> to vector<4x256xf32>
    %73 = arith.mulf %70, %72 : vector<4x256xf32>
    %c0_28 = arith.constant 0 : index
    %c0_29 = arith.constant 0 : index
    %74 = vector.load %arg5[%c0_28, %c0_29] : memref<36x256xf32, #tpu.memory_space<vmem>>, vector<4x256xf32>
    tpu.vector_store %arg5[%c0_28, %c0_29], %73 {strides = array<i32>} : memref<36x256xf32, #tpu.memory_space<vmem>>, vector<4x256xf32>,
    %c16_i32_30 = arith.constant 16 : i32
    %75 = tpu.dynamic_rotate %69 by %c16_i32_30 dim 1 : vector<4x256xf32>, i32 -> vector<4x256xf32>
    %76 = vector.extract_strided_slice %0 {offsets = [1, 0], sizes = [1, 256], strides = [1, 1]} : vector<8x256xf32> to vector<1x256xf32>
    %77 = vector.broadcast %76 : vector<1x256xf32> to vector<4x256xf32>
    %78 = arith.mulf %75, %77 : vector<4x256xf32>
    %c4_31 = arith.constant 4 : index
    %c0_32 = arith.constant 0 : index
    %79 = vector.load %arg5[%c4_31, %c0_32] : memref<36x256xf32, #tpu.memory_space<vmem>>, vector<4x256xf32>
    tpu.vector_store %arg5[%c4_31, %c0_32], %78 {strides = array<i32>} : memref<36x256xf32, #tpu.memory_space<vmem>>, vector<4x256xf32>,
    %c15_i32_33 = arith.constant 15 : i32
    %80 = tpu.dynamic_rotate %69 by %c15_i32_33 dim 1 : vector<4x256xf32>, i32 -> vector<4x256xf32>
    %81 = vector.extract_strided_slice %0 {offsets = [2, 0], sizes = [1, 256], strides = [1, 1]} : vector<8x256xf32> to vector<1x256xf32>
    %82 = vector.broadcast %81 : vector<1x256xf32> to vector<4x256xf32>
    %83 = arith.mulf %80, %82 : vector<4x256xf32>
    %c8_34 = arith.constant 8 : index
    %c0_35 = arith.constant 0 : index
    %84 = vector.load %arg5[%c8_34, %c0_35] : memref<36x256xf32, #tpu.memory_space<vmem>>, vector<4x256xf32>
    tpu.vector_store %arg5[%c8_34, %c0_35], %83 {strides = array<i32>} : memref<36x256xf32, #tpu.memory_space<vmem>>, vector<4x256xf32>,
    %c1_i32_36 = arith.constant 1 : i32
    %85 = tpu.dynamic_rotate %69 by %c1_i32_36 dim 1 : vector<4x256xf32>, i32 -> vector<4x256xf32>
    %86 = vector.extract_strided_slice %0 {offsets = [3, 0], sizes = [1, 256], strides = [1, 1]} : vector<8x256xf32> to vector<1x256xf32>
    %87 = vector.broadcast %86 : vector<1x256xf32> to vector<4x256xf32>
    %88 = arith.mulf %85, %87 : vector<4x256xf32>
    %c12_37 = arith.constant 12 : index
    %c0_38 = arith.constant 0 : index
    %89 = vector.load %arg5[%c12_37, %c0_38] : memref<36x256xf32, #tpu.memory_space<vmem>>, vector<4x256xf32>
    tpu.vector_store %arg5[%c12_37, %c0_38], %88 {strides = array<i32>} : memref<36x256xf32, #tpu.memory_space<vmem>>, vector<4x256xf32>,
    %c16_39 = arith.constant 16 : index
    %c0_40 = arith.constant 0 : index
    %90 = vector.load %arg5[%c16_39, %c0_40] : memref<36x256xf32, #tpu.memory_space<vmem>>, vector<4x256xf32>
    tpu.vector_store %arg5[%c16_39, %c0_40], %69 {strides = array<i32>} : memref<36x256xf32, #tpu.memory_space<vmem>>, vector<4x256xf32>,
    %c255_i32_41 = arith.constant 255 : i32
    %91 = tpu.dynamic_rotate %69 by %c255_i32_41 dim 1 : vector<4x256xf32>, i32 -> vector<4x256xf32>
    %92 = vector.extract_strided_slice %0 {offsets = [4, 0], sizes = [1, 256], strides = [1, 1]} : vector<8x256xf32> to vector<1x256xf32>
    %93 = vector.broadcast %92 : vector<1x256xf32> to vector<4x256xf32>
    %94 = arith.mulf %91, %93 : vector<4x256xf32>
    %c20_42 = arith.constant 20 : index
    %c0_43 = arith.constant 0 : index
    %95 = vector.load %arg5[%c20_42, %c0_43] : memref<36x256xf32, #tpu.memory_space<vmem>>, vector<4x256xf32>
    tpu.vector_store %arg5[%c20_42, %c0_43], %94 {strides = array<i32>} : memref<36x256xf32, #tpu.memory_space<vmem>>, vector<4x256xf32>,
    %c241_i32_44 = arith.constant 241 : i32
    %96 = tpu.dynamic_rotate %69 by %c241_i32_44 dim 1 : vector<4x256xf32>, i32 -> vector<4x256xf32>
    %97 = vector.extract_strided_slice %0 {offsets = [5, 0], sizes = [1, 256], strides = [1, 1]} : vector<8x256xf32> to vector<1x256xf32>
    %98 = vector.broadcast %97 : vector<1x256xf32> to vector<4x256xf32>
    %99 = arith.mulf %96, %98 : vector<4x256xf32>
    %c24_45 = arith.constant 24 : index
    %c0_46 = arith.constant 0 : index
    %100 = vector.load %arg5[%c24_45, %c0_46] : memref<36x256xf32, #tpu.memory_space<vmem>>, vector<4x256xf32>
    tpu.vector_store %arg5[%c24_45, %c0_46], %99 {strides = array<i32>} : memref<36x256xf32, #tpu.memory_space<vmem>>, vector<4x256xf32>,
    %c240_i32_47 = arith.constant 240 : i32
    %101 = tpu.dynamic_rotate %69 by %c240_i32_47 dim 1 : vector<4x256xf32>, i32 -> vector<4x256xf32>
    %102 = vector.extract_strided_slice %0 {offsets = [6, 0], sizes = [1, 256], strides = [1, 1]} : vector<8x256xf32> to vector<1x256xf32>
    %103 = vector.broadcast %102 : vector<1x256xf32> to vector<4x256xf32>
    %104 = arith.mulf %101, %103 : vector<4x256xf32>
    %c28_48 = arith.constant 28 : index
    %c0_49 = arith.constant 0 : index
    %105 = vector.load %arg5[%c28_48, %c0_49] : memref<36x256xf32, #tpu.memory_space<vmem>>, vector<4x256xf32>
    tpu.vector_store %arg5[%c28_48, %c0_49], %104 {strides = array<i32>} : memref<36x256xf32, #tpu.memory_space<vmem>>, vector<4x256xf32>,
    %c239_i32_50 = arith.constant 239 : i32
    %106 = tpu.dynamic_rotate %69 by %c239_i32_50 dim 1 : vector<4x256xf32>, i32 -> vector<4x256xf32>
    %107 = vector.extract_strided_slice %0 {offsets = [7, 0], sizes = [1, 256], strides = [1, 1]} : vector<8x256xf32> to vector<1x256xf32>
    %108 = vector.broadcast %107 : vector<1x256xf32> to vector<4x256xf32>
    %109 = arith.mulf %106, %108 : vector<4x256xf32>
    %c32_51 = arith.constant 32 : index
    %c0_52 = arith.constant 0 : index
    %110 = vector.load %arg5[%c32_51, %c0_52] : memref<36x256xf32, #tpu.memory_space<vmem>>, vector<4x256xf32>
    tpu.vector_store %arg5[%c32_51, %c0_52], %109 {strides = array<i32>} : memref<36x256xf32, #tpu.memory_space<vmem>>, vector<4x256xf32>,
    %c0_53 = arith.constant 0 : index
    %c0_54 = arith.constant 0 : index
    %111 = vector.load %arg5[%c0_53, %c0_54] : memref<36x256xf32, #tpu.memory_space<vmem>>, vector<36x256xf32>
    %cst_55 = arith.constant dense<0.000000e+00> : vector<4x256xf32>
    %112 = tpu.matmul %4, %111, %cst_55 {dimension_numbers = #tpu.dot_dimension_numbers<[1], [0], [0], [1], [0, 0, 1, 1], [], []>} : vector<4x36xf32>, vector<36x256xf32>, vector<4x256xf32> -> vector<4x256xf32>
    %cst_56 = arith.constant dense<0.000000e+00> : vector<4xf32>
    %113 = vector.multi_reduction <add>, %112, %cst_56 [1] : vector<4x256xf32> to vector<4xf32>
    %114 = vector.shape_cast %113 : vector<4xf32> to vector<4x1xf32>
    %cst_57 = arith.constant 3.906250e-03 : f32
    %115 = vector.broadcast %cst_57 : f32 to vector<4x1xf32>
    %116 = arith.mulf %114, %115 : vector<4x1xf32>
    %117 = arith.mulf %112, %112 : vector<4x256xf32>
    %cst_58 = arith.constant dense<0.000000e+00> : vector<4xf32>
    %118 = vector.multi_reduction <add>, %117, %cst_58 [1] : vector<4x256xf32> to vector<4xf32>
    %119 = vector.shape_cast %118 : vector<4xf32> to vector<4x1xf32>
    %cst_59 = arith.constant 3.906250e-03 : f32
    %120 = vector.broadcast %cst_59 : f32 to vector<4x1xf32>
    %121 = arith.mulf %119, %120 : vector<4x1xf32>
    %122 = arith.mulf %116, %116 : vector<4x1xf32>
    %123 = arith.subf %121, %122 : vector<4x1xf32>
    %124 = vector.broadcast %116 : vector<4x1xf32> to vector<4x256xf32>
    %125 = arith.subf %112, %124 : vector<4x256xf32>
    %cst_60 = arith.constant 9.99999974E-6 : f32
    %126 = vector.broadcast %cst_60 : f32 to vector<4x1xf32>
    %127 = arith.addf %123, %126 : vector<4x1xf32>
    %128 = math.rsqrt %127 : vector<4x1xf32>
    %129 = vector.broadcast %128 : vector<4x1xf32> to vector<4x256xf32>
    %130 = arith.mulf %125, %129 : vector<4x256xf32>
    %131 = arith.addf %130, %6 : vector<4x256xf32>
    %c0_61 = arith.constant 0 : index
    %c0_62 = arith.constant 0 : index
    %c0_63 = arith.constant 0 : index
    %132 = vector.load %arg4[%c0_61, %c0_62, %c0_63] : memref<1x4x256xf32, #tpu.memory_space<vmem>>, vector<1x4x256xf32>
    %133 = vector.shape_cast %132 : vector<1x4x256xf32> to vector<4x256xf32>
    %134 = vector.shape_cast %131 : vector<4x256xf32> to vector<1x4x256xf32>
    tpu.vector_store %arg4[%c0_61, %c0_62, %c0_63], %134 {strides = array<i32>} : memref<1x4x256xf32, #tpu.memory_space<vmem>>, vector<1x4x256xf32>,
    return
  }
  func.func @transform_0(%arg0: i32) -> (i32, i32, i32) {
    %c0_i32 = arith.constant 0 : i32
    %c0_i32_0 = arith.constant 0 : i32
    %c0_i32_1 = arith.constant 0 : i32
    return %arg0, %c0_i32, %c0_i32_0 : i32, i32, i32
  }
  func.func @transform_1(%arg0: i32) -> (i32, i32, i32) {
    %c0_i32 = arith.constant 0 : i32
    %c0_i32_0 = arith.constant 0 : i32
    %c0_i32_1 = arith.constant 0 : i32
    %c0_i32_2 = arith.constant 0 : i32
    return %c0_i32, %c0_i32_0, %c0_i32_1 : i32, i32, i32
  }
  func.func @transform_2(%arg0: i32) -> (i32, i32) {
    %c0_i32 = arith.constant 0 : i32
    %c0_i32_0 = arith.constant 0 : i32
    %c0_i32_1 = arith.constant 0 : i32
    return %c0_i32, %c0_i32_0 : i32, i32
  }
  func.func @transform_3(%arg0: i32) -> (i32, i32, i32) {
    %c0_i32 = arith.constant 0 : i32
    %c0_i32_0 = arith.constant 0 : i32
    %c0_i32_1 = arith.constant 0 : i32
    return %arg0, %c0_i32, %c0_i32_0 : i32, i32, i32
  }
}

</mosaic_0001>

<bundles_post_ra>
// kernel: res_block_forward.1
= control target key start
LH: loop header
LB: loop body
LE: loop exit
PB: predicated region body
PF: predicated region fallthrough
CT: control target
= control target key end

     0   :  { %s851_s12 = smov 0   ;;  %s1127_s0 = inlined_call_operand.vmem [shape: f32[2,4,256], index: 0, kind: input, shape index: {}]   ;;  %s1128_s1 = inlined_call_operand.vmem [shape: f32[2,4,36], index: 1, kind: input, shape index: {}]   ;;  %s1129_s2 = inlined_call_operand.vmem [shape: f32[8,256], index: 2, kind: input, shape index: {}]   ;;  %s1130_s3 = inlined_call_operand.vmem [shape: f32[2,4,256], index: 3, kind: output, shape index: {}]  }
   0x1 LB: > { %s756_s13 = sadd.s32 4294967295, %s820_s12   ;;  %p760_p0 = scmp.ge.s32.totalorder %s820_s12, 1  ;;  %s820_s12 = sphi %s851_s12, %s13_s12  }
   0x2   : > { %p137_p1 = scmp.lt.s32.totalorder %s820_s12, 3 }
   0x4   : > { %p138_p2 = pnand %p760_p0, %p137_p1 }
   0x5   : > { %p161_p3 = scmp.lt.s32.totalorder (!%p138_p2), %s756_s13, 1  ;;  %s822_s18 = smov (!%p138_p2), 1   ;;  %v830_v2 = vmov (!%p138_p2), 0.0   ;;  %v184_v3 = vlaneseq (!%p138_p2)  ;;  %v915_v7 = vld [vmem:[%s1129_s2] sm:$0xff] (!%p138_p2)  ;;  %v920_v8 = vld [vmem:[%s1129_s2 + $0x8] sm:$0xff] (!%p138_p2)  ;;  %vm374_vm8 = vcmask (!%p138_p2), 1043456  }
   0x6   : > { %141 = sbr.rel (%p138_p2) target bundleno = 1098 (0x44a), region = 32  ;;  %s823_s19 = smov (!%p138_p2), 16   ;;  %445 = vmatprep.mubr.f32.mxu0 (!%p138_p2), %v830_v2  ;;  %665 = vmatprep.mubr.f32.mxu1 (!%p138_p2), %v830_v2  ;;  %vm370_vm9 = vcmask (!%p138_p2), 293888  }
   0x7   : > { %s824_s20 = smov (!%p138_p2), 17   ;;  %s825_s21 = smov (!%p138_p2), 15   ;;  %v907_v4 = vshrl.u32 (!%p138_p2), %v184_v3, 7  ;;  %v909_v5 = vand.u32 (!%p138_p2), 127, %v184_v3 }
   0x8   : > { %s826_s22 = smov (!%p138_p2), 127   ;;  %s827_s23 = smov (!%p138_p2), 112  }
   0x9   : > { %s828_s24 = smov (!%p138_p2), 113   ;;  %s829_s25 = smov (!%p138_p2), 111   ;;  %v254_v6 = vsub.s32 (!%p138_p2), 3, %v907_v4  ;;  %v191_v11 = vsub.s32 (!%p138_p2), 0, %v907_v4  ;;  %vm249_vm0 = vcmp.lt.s32.totalorder (!%p138_p2), %v909_v5, 1  ;;  %v210_v14 = vsub.s32 (!%p138_p2), 1, %v907_v4 }
   0xa   : > { %vm186_vm1 = vcmp.lt.s32.totalorder (!%p138_p2), %v909_v5, 17  ;;  %vm205_vm2 = vcmp.lt.s32.totalorder (!%p138_p2), %v909_v5, 16  ;;  %v235_v17 = vsub.s32 (!%p138_p2), 2, %v907_v4  ;;  %vm230_vm3 = vcmp.lt.s32.totalorder (!%p138_p2), %v909_v5, 15 }
   0xb   : > { %v925_v12 = vrot.slane (!%p138_p2), %v915_v7, %v254_v6  ;;  %v928_v13 = vrot.slane (!%p138_p2), %v920_v8, %v254_v6  ;;  %v939_v20 = vrot.slane (!%p138_p2), %v915_v7, %v191_v11  ;;  %v942_v21 = vrot.slane (!%p138_p2), %v920_v8, %v191_v11 }
   0xc   : > { %v947_v24 = vrot.slane (!%p138_p2), %v915_v7, %v210_v14  ;;  %v950_v25 = vrot.slane (!%p138_p2), %v920_v8, %v210_v14  ;;  %v281_v26 = vsub.s32 (!%p138_p2), 4, %v907_v4  ;;  %v955_v31 = vrot.slane (!%p138_p2), %v915_v7, %v235_v17 }
   0xd   : > { %s1132_s13 = smov (!%p161_p3, %s756_s13), 1  ;;  %v958_v32 = vrot.slane %v920_v8, %v235_v17  ;;  %vm276_vm4 = vcmp.lt.s32.totalorder %v909_v5, 127  ;;  %v325_v51 = vsub.s32 6, %v907_v4  ;;  %vm320_vm5 = vcmp.lt.s32.totalorder %v909_v5, 112 }
   0xe   : > { %s774_s14 = sshll.u32 %s1132_s13, 3  ;;  %v978_v47 = vrot.slane %v915_v7, %v281_v26  ;;  %v983_v50 = vrot.slane %v920_v8, %v281_v26  ;;  %v306_v56 = vsub.s32 5, %v907_v4  ;;  %vm301_vm6 = vcmp.lt.s32.totalorder %v909_v5, 113 }
   0xf   : > { %s165_s17 = scalar_lea.vmem %s1127_s0, %s774_s14  ;;  %v995_v59 = vrot.slane %v915_v7, %v325_v51  ;;  %v998_v60 = vrot.slane %v920_v8, %v325_v51  ;;  %vm345_vm7 = vcmp.lt.s32.totalorder %v909_v5, 111  ;;  %v173_v51 = vld [vmem:[%s1128_s1] sm:$0xf]  ;;  %v765_v5 = vld [vmem:[%s1128_s1 + $0x4] sm:$0xf]  ;;  %s170_s9 = scalar_lea.vmem %s1130_s3, %s774_s14 }
  0x10   : > { %v867_v0 = vld [vmem:[%s165_s17] sm:$0xff]  ;;  %v1011_v14 = vrot.slane %v920_v8, %v306_v56 }
  0x11   : > { %245 = vrot.lane.b32.xlu1 %v867_v0, %s822_s18  ;;  %270 = vst [vmem:[#allocation2 + $0x20] sm:$0xf] %v867_v0  ;;  %201 = vrot.lane.b32.xlu0 %v867_v0, %s823_s19  ;;  %v876_v1 = vcombine.high %v867_v0, %v867_v0 }
  0x13   : > { %271 = vst [vmem:[#allocation2 + $0x28] sm:$0xf] %v876_v1 }
  0x15   : > { %180 = vrot.lane.b32.xlu0 %v867_v0, %s824_s20  ;;  %247 = vrot.lane.b32.xlu1 %v876_v1, %s822_s18 }
  0x19   : > { %182 = vrot.lane.b32.xlu1 %v876_v1, %s824_s20  ;;  %203 = vrot.lane.b32.xlu0 %v876_v1, %s823_s19 }
  0x1d   : > { %228 = vrot.lane.b32.xlu1 %v876_v1, %s825_s21  ;;  %226 = vrot.lane.b32.xlu0 %v867_v0, %s825_s21 }
  0x21   : > { %274 = vrot.lane.b32.xlu1 %v876_v1, %s826_s22  ;;  %272 = vrot.lane.b32.xlu0 %v867_v0, %s826_s22 }
  0x25   : > { %318 = vrot.lane.b32.xlu1 %v876_v1, %s827_s23  ;;  %316 = vrot.lane.b32.xlu0 %v867_v0, %s827_s23 }
  0x29   : > { %299 = vrot.lane.b32.xlu1 %v876_v1, %s828_s24  ;;  %297 = vrot.lane.b32.xlu0 %v867_v0, %s828_s24 }
  0x2d   : > { %343 = vrot.lane.b32.xlu1 %v876_v1, %s829_s25  ;;  %341 = vrot.lane.b32.xlu0 %v867_v0, %s829_s25 }
  0x83   : > { %v246_v9 = vpop.permute.xlu1 %245  ;;  %v202_v10 = vpop.permute.xlu0 %201 }
  0x87   : > { %v181_v15 = vpop.permute.xlu0 %180  ;;  %v248_v16 = vpop.permute.xlu1 %247 }
  0x88   : > { %v250_v18 = vsel %vm249_vm0, %v246_v9, %v248_v16  ;;  %v251_v19 = vsel %vm249_vm0, %v248_v16, %v246_v9  ;;  %v1006_v9 = vrot.slane %v915_v7, %v306_v56  ;;  %v350_v16 = vsub.s32 7, %v907_v4 }
  0x89   : > { %v260_v22 = vmul.f32 %v925_v12, %v251_v19  ;;  %v261_v23 = vmul.f32 %v928_v13, %v250_v18 }
  0x8b   : > { %v264_v27 = vrot.slane %v260_v22, 4  ;;  %v265_v28 = vrot.slane %v261_v23, 4  ;;  %v183_v29 = vpop.permute.xlu1 %182  ;;  %v204_v30 = vpop.permute.xlu0 %203 }
  0x8c   : > { %v187_v33 = vsel %vm186_vm1, %v181_v15, %v183_v29  ;;  %v188_v34 = vsel %vm186_vm1, %v183_v29, %v181_v15  ;;  %v206_v35 = vsel %vm205_vm2, %v202_v10, %v204_v30  ;;  %v207_v36 = vsel %vm205_vm2, %v204_v30, %v202_v10 }
  0x8d   : > { %268 = vst [vmem:[#allocation2 + $0x10] sm:$0xf0] %v264_v27  ;;  %269 = vst [vmem:[#allocation2 + $0x18] sm:$0xf0] %v265_v28  ;;  %v197_v37 = vmul.f32 %v939_v20, %v188_v34  ;;  %v198_v38 = vmul.f32 %v942_v21, %v187_v33  ;;  %v216_v39 = vmul.f32 %v947_v24, %v207_v36 }
  0x8e   : > { %v217_v40 = vmul.f32 %v950_v25, %v206_v35  ;;  %v1022_v35 = vrot.slane %v915_v7, %v350_v16  ;;  %v1025_v36 = vrot.slane %v920_v8, %v350_v16 }
  0x8f   : > { %199 = vst [vmem:[#allocation2] sm:$0xf] %v197_v37  ;;  %200 = vst [vmem:[#allocation2 + $0x8] sm:$0xf] %v198_v38  ;;  %v220_v41 = vrot.slane %v216_v39, 4  ;;  %v229_v43 = vpop.permute.xlu1 %228  ;;  %v227_v44 = vpop.permute.xlu0 %226 }
  0x90   : > { %v221_v42 = vrot.slane %v217_v40, 4  ;;  %v231_v45 = vsel %vm230_vm3, %v227_v44, %v229_v43  ;;  %v232_v46 = vsel %vm230_vm3, %v229_v43, %v227_v44 }
  0x91   : > { %224 = vst [vmem:[#allocation2] sm:$0xf0] %v220_v41  ;;  %v241_v48 = vmul.f32 %v955_v31, %v232_v46  ;;  %v242_v49 = vmul.f32 %v958_v32, %v231_v45 }
  0x92   : > { %225 = vst [vmem:[#allocation2 + $0x8] sm:$0xf0] %v221_v42 }
  0x93   : > { %243 = vst [vmem:[#allocation2 + $0x10] sm:$0xf] %v241_v48  ;;  %244 = vst [vmem:[#allocation2 + $0x18] sm:$0xf] %v242_v49  ;;  %v275_v52 = vpop.permute.xlu1 %274  ;;  %v273_v53 = vpop.permute.xlu0 %272 }
  0x94   : > { %v277_v54 = vsel %vm276_vm4, %v273_v53, %v275_v52  ;;  %v278_v55 = vsel %vm276_vm4, %v275_v52, %v273_v53 }
  0x95   : > { %v287_v57 = vmul.f32 %v978_v47, %v277_v54  ;;  %v288_v58 = vmul.f32 %v983_v50, %v278_v55 }
  0x97   : > { %v291_v61 = vrot.slane %v287_v57, 4  ;;  %v292_v62 = vrot.slane %v288_v58, 4  ;;  %v319_v63 = vpop.permute.xlu1 %318  ;;  %v317_v2 = vpop.permute.xlu0 %316 }
  0x98   : > { %v321_v3 = vsel %vm320_vm5, %v317_v2, %v319_v63  ;;  %v322_v6 = vsel %vm320_vm5, %v319_v63, %v317_v2  ;;  %v360_v18 = vld [vmem:[#allocation2] sm:$0xff] }
  0x99   : > { %295 = vst [vmem:[#allocation2 + $0x20] sm:$0xf0] %v291_v61  ;;  %296 = vst [vmem:[#allocation2 + $0x28] sm:$0xf0] %v292_v62  ;;  %v331_v10 = vmul.f32 %v995_v59, %v321_v3  ;;  %v332_v11 = vmul.f32 %v998_v60, %v322_v6  ;;  %v361_v15 = vld [vmem:[#allocation2 + $0x8] sm:$0xff] }
  0x9a   : > { %v363_v17 = vld [vmem:[#allocation2 + $0x18] sm:$0xff]  ;;  %v362_v19 = vld [vmem:[#allocation2 + $0x10] sm:$0xff] }
  0x9b   : > { %v335_v22 = vrot.slane %v331_v10, 4  ;;  %v336_v23 = vrot.slane %v332_v11, 4  ;;  %v300_v26 = vpop.permute.xlu1 %299  ;;  %v298_v27 = vpop.permute.xlu0 %297  ;;  %v776_v28 = vpack.c.bf16 %v363_v17, %v361_v15  ;;  %v778_v29 = vpack.c.bf16 %v362_v19, %v360_v18 }
  0x9c   : > { %v302_v30 = vsel %vm301_vm6, %v298_v27, %v300_v26  ;;  %v303_v33 = vsel %vm301_vm6, %v300_v26, %v298_v27 }
  0x9d   : > { %339 = vst [vmem:[#allocation2 + $0x30] sm:$0xf0] %v335_v22  ;;  %340 = vst [vmem:[#allocation2 + $0x38] sm:$0xf0] %v336_v23  ;;  %v312_v4 = vmul.f32 %v1006_v9, %v302_v30  ;;  %v313_v34 = vmul.f32 %v1011_v14, %v303_v33  ;;  %777 = vmatprep.subr.bf16.mxu0 %v776_v28 }
  0x9e   : > { %779 = vmatpush1.bf16.msra.mxu0 %v778_v29 }
  0x9f   : > { %314 = vst [vmem:[#allocation2 + $0x30] sm:$0xf] %v312_v4  ;;  %315 = vst [vmem:[#allocation2 + $0x38] sm:$0xf] %v313_v34  ;;  %v344_v37 = vpop.permute.xlu1 %343  ;;  %v342_v38 = vpop.permute.xlu0 %341 }
  0xa0   : > { %v346_v39 = vsel %vm345_vm7, %v342_v38, %v344_v37  ;;  %v347_v40 = vsel %vm345_vm7, %v344_v37, %v342_v38  ;;  %v365_v7 = vld [vmem:[#allocation2 + $0x28] sm:$0xff]  ;;  %v364_v43 = vld [vmem:[#allocation2 + $0x20] sm:$0xff] }
  0xa1   : > { %v356_v41 = vmul.f32 %v1022_v35, %v346_v39  ;;  %v357_v42 = vmul.f32 %v1025_v36, %v347_v40 }
  0xa3   : > { %358 = vst [vmem:[#allocation2 + $0x40] sm:$0xf] %v356_v41  ;;  %359 = vst [vmem:[#allocation2 + $0x48] sm:$0xf] %v357_v42 }
  0xa6   : > { %v367_v8 = vld [vmem:[#allocation2 + $0x38] sm:$0xff]  ;;  %v366_v44 = vld [vmem:[#allocation2 + $0x30] sm:$0xff] }
  0xa7   : > { %v780_v45 = vpack.c.bf16 %v367_v8, %v365_v7  ;;  %v782_v46 = vpack.c.bf16 %v366_v44, %v364_v43 }
  0xa9   : > { %781 = vmatprep.subr.bf16.mxu0 %v780_v45 }
  0xaa   : > { %783 = vmatpush1.bf16.msra.mxu0 %v782_v46  ;;  %v369_v48 = vld [vmem:[#allocation2 + $0x48] sm:$0xf]  ;;  %v368_v49 = vld [vmem:[#allocation2 + $0x40] sm:$0xf] }
  0xab   : > { %766 = vmatprep.subr.msk.mxu0 %vm374_vm8, %v369_v48 }
  0xae   : > { %767 = vmatpush1.msk.msra.mxu0 %vm374_vm8, %v368_v49 }
  0xaf   : > { %768 = vmatmul.mubr.msk.f32.vlgmr.msra.gmra.mrb[0].mxu0 %vm370_vm9, %v173_v51 }
 0x182   : > { %v447_v52 = vpop.f32.mrb[0].mxu0 }
 0x183   : > { %v458_v53 = vmul.f32 %v447_v52, %v447_v52  ;;  %v449_v54 = vpop.f32.mrb[1].mxu0  ;;  %v452_v55 = vsel %vm374_vm8, %v447_v52, 0.0 }
 0x184   : > { %v453_v56 = vsel %vm374_vm8, %v449_v54, 0.0  ;;  %v459_v57 = vmul.f32 %v449_v54, %v449_v54 }
 0x185   : > { %v454_v58 = vadd.f32 %v453_v56, %v452_v55  ;;  %v460_v61 = vsel %vm374_vm8, %v458_v53, 0.0 }
 0x186   : > { %v461_v62 = vsel %vm374_vm8, %v459_v57, 0.0 }
 0x187   : > { %455 = vadd.xlane.f32.xlu0 %v454_v58  ;;  %v462_v63 = vadd.f32 %v461_v62, %v460_v61 }
 0x189   : > { %463 = vadd.xlane.f32.xlu1 %v462_v63 }
 0x214   : > { %v456_v2 = vpop.xlane.xlu0 %455 }
 0x215   : > { %v457_v3 = vmul.f32 0.00390625, %v456_v2 }
 0x216   : > { %v464_v6 = vpop.xlane.xlu1 %463 }
 0x217   : > { %v465_v10 = vmul.f32 0.00390625, %v464_v6  ;;  %v466_v11 = vmul.f32 %v457_v3, %v457_v3  ;;  %v468_v17 = vsub.f32 %v447_v52, %v457_v3  ;;  %v469_v18 = vsub.f32 %v449_v54, %v457_v3 }
 0x219   : > { %v467_v15 = vsub.f32 %v465_v10, %v466_v11 }
 0x21b   : > { %v470_v16 = vadd.f32 1e-05, %v467_v15 }
 0x21d   : > { %810 = vrsqrt.f32 %v470_v16 }
 0x227   : > { %v811_v19 = vpop.eup %810 }
 0x228   : > { %v472_v22 = vmul.f32 %v811_v19, %v468_v17  ;;  %v473_v23 = vmul.f32 %v811_v19, %v469_v18 }
 0x22a   : > { %v474_v26 = vmax.f32 %v472_v22, 0.0  ;;  %v475_v27 = vmax.f32 %v473_v23, 0.0 }
 0x22c   : > { %528 = vst [vmem:[#allocation2 + $0x20] sm:$0xf] %v474_v26  ;;  %529 = vst [vmem:[#allocation2 + $0x28] sm:$0xf] %v475_v27  ;;  %488 = vrot.lane.b32.xlu1 %v475_v27, %s823_s19  ;;  %486 = vrot.lane.b32.xlu0 %v474_v26, %s823_s19 }
 0x230   : > { %514 = vrot.lane.b32.xlu1 %v475_v27, %s822_s18  ;;  %512 = vrot.lane.b32.xlu0 %v474_v26, %s822_s18 }
 0x234   : > { %478 = vrot.lane.b32.xlu1 %v475_v27, %s824_s20  ;;  %476 = vrot.lane.b32.xlu0 %v474_v26, %s824_s20 }
 0x238   : > { %504 = vrot.lane.b32.xlu1 %v475_v27, %s825_s21  ;;  %502 = vrot.lane.b32.xlu0 %v474_v26, %s825_s21 }
 0x23c   : > { %532 = vrot.lane.b32.xlu1 %v475_v27, %s826_s22  ;;  %530 = vrot.lane.b32.xlu0 %v474_v26, %s826_s22 }
 0x240   : > { %558 = vrot.lane.b32.xlu1 %v475_v27, %s827_s23  ;;  %556 = vrot.lane.b32.xlu0 %v474_v26, %s827_s23 }
 0x244   : > { %548 = vrot.lane.b32.xlu1 %v475_v27, %s828_s24  ;;  %546 = vrot.lane.b32.xlu0 %v474_v26, %s828_s24 }
 0x248   : > { %574 = vrot.lane.b32.xlu1 %v475_v27, %s829_s25  ;;  %572 = vrot.lane.b32.xlu0 %v474_v26, %s829_s25 }
 0x29e   : > { %v489_v28 = vpop.permute.xlu1 %488  ;;  %v487_v29 = vpop.permute.xlu0 %486 }
 0x29f   : > { %v490_v30 = vsel %vm205_vm2, %v487_v29, %v489_v28  ;;  %v491_v33 = vsel %vm205_vm2, %v489_v28, %v487_v29 }
 0x2a0   : > { %v492_v4 = vmul.f32 %v491_v33, %v947_v24  ;;  %v493_v34 = vmul.f32 %v490_v30, %v950_v25 }
 0x2a2   : > { %v496_v37 = vrot.slane %v492_v4, 4  ;;  %v497_v38 = vrot.slane %v493_v34, 4  ;;  %v515_v39 = vpop.permute.xlu1 %514  ;;  %v513_v40 = vpop.permute.xlu0 %512 }
 0x2a3   : > { %v516_v41 = vsel %vm249_vm0, %v513_v40, %v515_v39  ;;  %v517_v42 = vsel %vm249_vm0, %v515_v39, %v513_v40 }
 0x2a4   : > { %500 = vst [vmem:[#allocation2] sm:$0xf0] %v496_v37  ;;  %501 = vst [vmem:[#allocation2 + $0x8] sm:$0xf0] %v497_v38  ;;  %v518_v7 = vmul.f32 %v517_v42, %v925_v12  ;;  %v519_v8 = vmul.f32 %v516_v41, %v928_v13 }
 0x2a6   : > { %v522_v43 = vrot.slane %v518_v7, 4  ;;  %v523_v24 = vrot.slane %v519_v8, 4  ;;  %v479_v44 = vpop.permute.xlu1 %478  ;;  %v477_v25 = vpop.permute.xlu0 %476 }
 0x2a7   : > { %v480_v45 = vsel %vm186_vm1, %v477_v25, %v479_v44  ;;  %v481_v46 = vsel %vm186_vm1, %v479_v44, %v477_v25 }
 0x2a8   : > { %526 = vst [vmem:[#allocation2 + $0x10] sm:$0xf0] %v522_v43  ;;  %527 = vst [vmem:[#allocation2 + $0x18] sm:$0xf0] %v523_v24  ;;  %v482_v48 = vmul.f32 %v481_v46, %v939_v20  ;;  %v483_v49 = vmul.f32 %v480_v45, %v942_v21 }
 0x2aa   : > { %484 = vst [vmem:[#allocation2] sm:$0xf] %v482_v48  ;;  %485 = vst [vmem:[#allocation2 + $0x8] sm:$0xf] %v483_v49  ;;  %v505_v12 = vpop.permute.xlu1 %504  ;;  %v503_v13 = vpop.permute.xlu0 %502 }
 0x2ab   : > { %v506_v51 = vsel %vm230_vm3, %v503_v13, %v505_v12  ;;  %v507_v52 = vsel %vm230_vm3, %v505_v12, %v503_v13 }
 0x2ac   : > { %v508_v53 = vmul.f32 %v507_v52, %v955_v31  ;;  %v509_v54 = vmul.f32 %v506_v51, %v958_v32 }
 0x2ae   : > { %510 = vst [vmem:[#allocation2 + $0x10] sm:$0xf] %v508_v53  ;;  %511 = vst [vmem:[#allocation2 + $0x18] sm:$0xf] %v509_v54  ;;  %v533_v55 = vpop.permute.xlu1 %532  ;;  %v531_v20 = vpop.permute.xlu0 %530 }
 0x2af   : > { %v534_v21 = vsel %vm276_vm4, %v531_v20, %v533_v55  ;;  %v535_v56 = vsel %vm276_vm4, %v533_v55, %v531_v20 }
 0x2b0   : > { %v536_v57 = vmul.f32 %v534_v21, %v978_v47  ;;  %v537_v58 = vmul.f32 %v535_v56, %v983_v50 }
 0x2b1   : > { %v583_v10 = vld [vmem:[#allocation2 + $0x8] sm:$0xff]  ;;  %v582_v11 = vld [vmem:[#allocation2] sm:$0xff] }
 0x2b2   : > { %v540_v61 = vrot.slane %v536_v57, 4  ;;  %v541_v62 = vrot.slane %v537_v58, 4  ;;  %v559_v63 = vpop.permute.xlu1 %558  ;;  %v557_v31 = vpop.permute.xlu0 %556 }
 0x2b3   : > { %v560_v32 = vsel %vm320_vm5, %v557_v31, %v559_v63  ;;  %v561_v2 = vsel %vm320_vm5, %v559_v63, %v557_v31 }
 0x2b4   : > { %544 = vst [vmem:[#allocation2 + $0x20] sm:$0xf0] %v540_v61  ;;  %545 = vst [vmem:[#allocation2 + $0x28] sm:$0xf0] %v541_v62  ;;  %v562_v3 = vmul.f32 %v560_v32, %v995_v59  ;;  %v563_v6 = vmul.f32 %v561_v2, %v998_v60 }
 0x2b5   : > { %v585_v47 = vld [vmem:[#allocation2 + $0x18] sm:$0xff]  ;;  %v584_v50 = vld [vmem:[#allocation2 + $0x10] sm:$0xff] }
 0x2b6   : > { %v566_v15 = vrot.slane %v562_v3, 4  ;;  %v567_v16 = vrot.slane %v563_v6, 4  ;;  %v549_v17 = vpop.permute.xlu1 %548  ;;  %v547_v18 = vpop.permute.xlu0 %546  ;;  %v784_v19 = vpack.c.bf16 %v585_v47, %v583_v10  ;;  %v786_v22 = vpack.c.bf16 %v584_v50, %v582_v11 }
 0x2b7   : > { %v550_v23 = vsel %vm301_vm6, %v547_v18, %v549_v17  ;;  %v551_v26 = vsel %vm301_vm6, %v549_v17, %v547_v18 }
 0x2b8   : > { %570 = vst [vmem:[#allocation2 + $0x30] sm:$0xf0] %v566_v15  ;;  %571 = vst [vmem:[#allocation2 + $0x38] sm:$0xf0] %v567_v16  ;;  %v552_v59 = vmul.f32 %v550_v23, %v1006_v9  ;;  %v553_v60 = vmul.f32 %v551_v26, %v1011_v14  ;;  %785 = vmatprep.subr.bf16.mxu1 %v784_v19 }
 0x2b9   : > { %787 = vmatpush1.bf16.msra.mxu1 %v786_v22 }
 0x2ba   : > { %554 = vst [vmem:[#allocation2 + $0x30] sm:$0xf] %v552_v59  ;;  %555 = vst [vmem:[#allocation2 + $0x38] sm:$0xf] %v553_v60  ;;  %v575_v27 = vpop.permute.xlu1 %574  ;;  %v573_v28 = vpop.permute.xlu0 %572 }
 0x2bb   : > { %v576_v29 = vsel %vm345_vm7, %v573_v28, %v575_v27  ;;  %v577_v30 = vsel %vm345_vm7, %v575_v27, %v573_v28  ;;  %v587_v9 = vld [vmem:[#allocation2 + $0x28] sm:$0xff]  ;;  %v586_v34 = vld [vmem:[#allocation2 + $0x20] sm:$0xff] }
 0x2bc   : > { %v578_v33 = vmul.f32 %v576_v29, %v1022_v35  ;;  %v579_v4 = vmul.f32 %v577_v30, %v1025_v36 }
 0x2be   : > { %580 = vst [vmem:[#allocation2 + $0x40] sm:$0xf] %v578_v33  ;;  %581 = vst [vmem:[#allocation2 + $0x48] sm:$0xf] %v579_v4 }
 0x2c1   : > { %v589_v14 = vld [vmem:[#allocation2 + $0x38] sm:$0xff]  ;;  %v588_v37 = vld [vmem:[#allocation2 + $0x30] sm:$0xff] }
 0x2c2   : > { %v788_v38 = vpack.c.bf16 %v589_v14, %v587_v9  ;;  %v790_v39 = vpack.c.bf16 %v588_v37, %v586_v34 }
 0x2c4   : > { %789 = vmatprep.subr.bf16.mxu1 %v788_v38 }
 0x2c5   : > { %791 = vmatpush1.bf16.msra.mxu1 %v790_v39  ;;  %v591_v40 = vld [vmem:[#allocation2 + $0x48] sm:$0xf]  ;;  %v590_v35 = vld [vmem:[#allocation2 + $0x40] sm:$0xf] }
 0x2c6   : > { %769 = vmatprep.subr.msk.mxu1 %vm374_vm8, %v591_v40 }
 0x2c9   : > { %770 = vmatpush1.msk.msra.mxu1 %vm374_vm8, %v590_v35 }
 0x2ca   : > { %771 = vmatmul.mubr.msk.f32.vlgmr.msra.gmra.mrb[0].mxu1 %vm370_vm9, %v765_v5 }
 0x39d   : > { %v667_v36 = vpop.f32.mrb[0].mxu1 }
 0x39e   : > { %v678_v41 = vmul.f32 %v667_v36, %v667_v36  ;;  %v669_v42 = vpop.f32.mrb[1].mxu1  ;;  %v672_v7 = vsel %vm374_vm8, %v667_v36, 0.0 }
 0x39f   : > { %v673_v8 = vsel %vm374_vm8, %v669_v42, 0.0  ;;  %v679_v43 = vmul.f32 %v669_v42, %v669_v42 }
 0x3a0   : > { %v674_v24 = vadd.f32 %v673_v8, %v672_v7  ;;  %v680_v44 = vsel %vm374_vm8, %v678_v41, 0.0 }
 0x3a1   : > { %v681_v25 = vsel %vm374_vm8, %v679_v43, 0.0 }
 0x3a2   : > { %675 = vadd.xlane.f32.xlu0 %v674_v24  ;;  %v682_v45 = vadd.f32 %v681_v25, %v680_v44 }
 0x3a4   : > { %683 = vadd.xlane.f32.xlu1 %v682_v45 }
 0x42f   : > { %v676_v46 = vpop.xlane.xlu0 %675 }
 0x430   : > { %v677_v48 = vmul.f32 0.00390625, %v676_v46 }
 0x431   : > { %v684_v49 = vpop.xlane.xlu1 %683 }
 0x432   : > { %v685_v12 = vmul.f32 0.00390625, %v684_v49  ;;  %v686_v13 = vmul.f32 %v677_v48, %v677_v48  ;;  %v688_v53 = vsub.f32 %v667_v36, %v677_v48  ;;  %v689_v54 = vsub.f32 %v669_v42, %v677_v48 }
 0x434   : > { %v687_v51 = vsub.f32 %v685_v12, %v686_v13 }
 0x436   : > { %v690_v52 = vadd.f32 1e-05, %v687_v51 }
 0x438   : > { %812 = vrsqrt.f32 %v690_v52 }
 0x442   : > { %v813_v55 = vpop.eup %812 }
 0x443   : > { %v692_v20 = vmul.f32 %v813_v55, %v688_v53  ;;  %v693_v21 = vmul.f32 %v813_v55, %v689_v54 }
 0x445   : > { %v694_v56 = vadd.f32 %v692_v20, %v867_v0  ;;  %v695_v57 = vadd.f32 %v693_v21, %v876_v1 }
 0x447   : > { %v698_v58 = vcombine.low %v694_v56, %v695_v57 }
 0x449   : > { %700 = vst [vmem:[%s170_s9] sm:$0xff] %v698_v58 }
 0x44a PF: > { %s13_s12 = sadd.s32 1, %s820_s12  }
 0x44b   : > { %p10_p4 = scmp.ge.s32.totalorder %s13_s12, 4  }
 0x44d   :  { %12 = sbr.rel (!%p10_p4) target bundleno = 1 (0x1), region = 63 }

</bundles_post_ra>
